<compile_context>
chip_gen: v6e
topology: v6e:2x2x1
jax: 0.10.0
libtpu: 0.0.40
codegen_flags: <defaults>
</compile_context>

<pallas_src>
import functools
import math

import jax
import jax.numpy as jnp
from jax.experimental import pallas as pl
from jax.experimental.pallas import tpu as pltpu


def _attn_decoder_kernel(tok_ref, emb_ref, h0_ref, enc_ref, wa_ref, wc_ref,
                         wi_ref, wh_ref, wout_ref, bias_ref, out_ref, h_scr):
    """One decode step per grid iteration; hidden carried in VMEM scratch."""
    del tok_ref  # consumed by the index_maps (embedding row gather)
    f32 = jnp.float32
    bf16 = jnp.bfloat16
    dot = functools.partial(jnp.dot, preferred_element_type=f32)

    H = wh_ref.shape[0]          # hidden size
    L = wa_ref.shape[1]          # max_length
    V = wout_ref.shape[1]        # output (vocab) size
    t = pl.program_id(0)

    # hidden state: initialize from h0 on the first step, then carry in scratch
    @pl.when(t == 0)
    def _():
        h_scr[...] = h0_ref[...]

    emb = emb_ref[0]             # [1, H] f32, current token's embedding row
    hid = h_scr[...]             # [1, H] f32, carried GRU state
    emb_b = emb.astype(bf16)
    hid_b = hid.astype(bf16)

    # attn_weights = softmax(Linear_{2H->L}(cat(embedded, hidden)))
    # (weight split by row-halves; bf16 x bf16 -> f32 on the MXU)
    a_logits = (dot(emb_b, wa_ref[0:H, :]) + dot(hid_b, wa_ref[H:2 * H, :])
                + bias_ref[0:1, 0:L])                                  # [1, L]
    a_max = jnp.max(a_logits, axis=-1, keepdims=True)
    a_exp = jnp.exp(a_logits - a_max)
    denom = jnp.sum(a_exp, axis=-1, keepdims=True)
    attn_w = a_exp * pl.reciprocal(denom, approx=True)                 # [1, L]

    # attn_applied = bmm(attn_weights, encoder_outputs)
    attn_applied = dot(attn_w.astype(bf16), enc_ref[...])              # [1, H]

    # attn_combine(cat(embedded, attn_applied)) -> relu
    x = (dot(emb_b, wc_ref[0:H, :])
         + dot(attn_applied.astype(bf16), wc_ref[H:2 * H, :])
         + bias_ref[1:2, 0:H])
    x = jnp.maximum(x, 0.0)                                            # [1, H]

    # single-step GRU, PyTorch gate order (r, z, n), fused [H, 3H] gate weights
    gi = dot(x.astype(bf16), wi_ref[...]) + bias_ref[2:3, 0:3 * H]     # [1, 3H]
    gh = dot(hid_b, wh_ref[...]) + bias_ref[3:4, 0:3 * H]              # [1, 3H]
    rz = jax.nn.sigmoid(gi[:, 0:2 * H] + gh[:, 0:2 * H])               # fused r/z
    r = rz[:, 0:H]
    z = rz[:, H:2 * H]
    n = jnp.tanh(gi[:, 2 * H:3 * H] + r * gh[:, 2 * H:3 * H])
    h_new = (1.0 - z) * n + z * hid                                    # [1, H]
    h_scr[...] = h_new                                                 # carry

    # output = log_softmax(out(h_new))
    o_logits = dot(h_new.astype(bf16), wout_ref[...]) + bias_ref[4:5, 0:V]
    o_max = jnp.max(o_logits, axis=-1, keepdims=True)
    shifted = o_logits - o_max
    logp = shifted - jnp.log(jnp.sum(jnp.exp(shifted), axis=-1, keepdims=True))

    # one lane-dense store per step: [ logp | h_new | attn_w | zero-pad ]
    parts = [logp, h_new, attn_w]
    pad_w = out_ref.shape[-1] - (V + H + L)
    if pad_w:
        parts.append(jnp.zeros((1, pad_w), f32))
    out_ref[0] = jnp.concatenate(parts, axis=-1)


def attn_decoder_decode(params, token_ids, hidden, encoder_outputs):
    """Teacher-forced multi-step decode (T steps) in a single pallas_call.

    token_ids: int32 [T]; hidden: [1,1,H]; encoder_outputs: [L,H]
    returns (log_probs [T,V], hiddens [T,H], attn_weights [T,L])
    """
    H = hidden.shape[-1]
    L = encoder_outputs.shape[0]
    V = params["w_out"].shape[1]
    T = token_ids.shape[0]
    P = pl.cdiv(V + H + L, 128) * 128          # lane-dense packed output width

    emb3 = params["embedding"].reshape(-1, 1, H)          # [vocab, 1, H] f32
    h0 = hidden.reshape(1, H).astype(jnp.float32)
    enc = encoder_outputs.astype(jnp.bfloat16)            # MXU operand dtype
    tok = token_ids.astype(jnp.int32)

    grid_spec = pltpu.PrefetchScalarGridSpec(
        num_scalar_prefetch=1,
        grid=(T,),
        in_specs=[
            # embedding row for the current token (gathered in-kernel via prefetch)
            pl.BlockSpec((1, 1, H), lambda t, tok_ref: (tok_ref[t], 0, 0)),
            # everything below has a constant index_map -> DMA'd once, VMEM-resident
            pl.BlockSpec((1, H), lambda t, tok_ref: (0, 0)),          # h0
            pl.BlockSpec((L, H), lambda t, tok_ref: (0, 0)),          # encoder outputs
            pl.BlockSpec((2 * H, L), lambda t, tok_ref: (0, 0)),      # attn  [2H,L] bf16
            pl.BlockSpec((2 * H, H), lambda t, tok_ref: (0, 0)),      # attn_combine
            pl.BlockSpec((H, 3 * H), lambda t, tok_ref: (0, 0)),      # GRU W_ih
            pl.BlockSpec((H, 3 * H), lambda t, tok_ref: (0, 0)),      # GRU W_hh
            pl.BlockSpec((H, V), lambda t, tok_ref: (0, 0)),          # out   [H,V] bf16
            pl.BlockSpec(params["bias"].shape, lambda t, tok_ref: (0, 0)),  # [5,BW] f32
        ],
        out_specs=pl.BlockSpec((1, 1, P), lambda t, tok_ref: (t, 0, 0)),
        scratch_shapes=[pltpu.VMEM((1, H), jnp.float32)],             # hidden carry
    )

    packed = pl.pallas_call(
        _attn_decoder_kernel,
        grid_spec=grid_spec,
        out_shape=jax.ShapeDtypeStruct((T, 1, P), jnp.float32),
        compiler_params=pltpu.CompilerParams(
            dimension_semantics=("arbitrary",),       # sequential: hidden carry
            vmem_limit_bytes=32 * 1024 * 1024,        # size to resident weights at prod H/V
        ),
    )(tok, emb3, h0, enc, params["wa"], params["wc"], params["w_i"],
      params["w_h"], params["w_out"], params["bias"])

    packed = packed.reshape(T, P)
    logp = packed[:, 0:V]
    h_all = packed[:, V:V + H]
    attn_w = packed[:, V + H:V + H + L]
    return logp, h_all, attn_w


def attn_decoder_forward(params, input_idx, hidden, encoder_outputs):
    """Mirrors AttnDecoderRNN.forward (eval mode) — a single decode step."""
    H = hidden.shape[-1]
    tok = jnp.asarray(input_idx, jnp.int32).reshape(1)
    logp, h_all, attn_w = attn_decoder_decode(params, tok, hidden, encoder_outputs)
    return logp, h_all.reshape(1, 1, H), attn_w


def init_params(key, hidden_size, output_size, max_length):
    """Builds the fused / lane-aligned parameter layout directly."""
    H, V, L = hidden_size, output_size, max_length
    ks = jax.random.split(key, 12)
    b2h = 1.0 / math.sqrt(2 * H)
    bh = 1.0 / math.sqrt(H)

    def unif(k, shape, bound):
        return jax.random.uniform(k, shape, jnp.float32, -bound, bound)

    p = {}
    p["embedding"] = jax.random.normal(ks[0], (V, H), jnp.float32)
    # attn: Linear(2H -> L), transposed [2H, L]; rows 0..H act on embedded,
    # rows H..2H on hidden. Stored bf16 (MXU operand).
    p["wa"] = unif(ks[1], (2 * H, L), b2h).astype(jnp.bfloat16)
    # attn_combine: Linear(2H -> H), transposed [2H, H]; rows 0..H -> embedded,
    # rows H..2H -> attn_applied.
    p["wc"] = unif(ks[2], (2 * H, H), b2h).astype(jnp.bfloat16)
    # GRU (single layer/step), gates fused along columns in PyTorch order (r,z,n).
    p["w_i"] = unif(ks[3], (H, 3 * H), bh).astype(jnp.bfloat16)
    p["w_h"] = unif(ks[4], (H, 3 * H), bh).astype(jnp.bfloat16)
    # out: Linear(H -> V), transposed [H, V].
    p["w_out"] = unif(ks[5], (H, V), bh).astype(jnp.bfloat16)
    # biases on separate sublane rows so every slice is lane-0 aligned:
    #   row 0: attn bias [L], row 1: attn_combine bias [H],
    #   row 2: GRU b_ih [3H], row 3: GRU b_hh [3H], row 4: out bias [V]
    BW = pl.cdiv(max(L, 3 * H, V), 128) * 128
    bias = jnp.zeros((5, BW), jnp.float32)
    bias = bias.at[0, :L].set(unif(ks[6], (L,), b2h))
    bias = bias.at[1, :H].set(unif(ks[7], (H,), b2h))
    bias = bias.at[2, :3 * H].set(unif(ks[8], (3 * H,), bh))
    bias = bias.at[3, :3 * H].set(unif(ks[9], (3 * H,), bh))
    bias = bias.at[4, :V].set(unif(ks[10], (V,), bh))
    p["bias"] = bias
    return p


def _reference_forward(params, input_idx, hidden, encoder_outputs):
    """Pure-JAX f32 reference mirroring the torch semantics (eval mode).

    Uses the same bf16-rounded weights / encoder outputs upcast to f32, so the
    only deviations vs. the kernel are bf16 rounding of the activation operands
    fed to the MXU and the approx reciprocal in the attention softmax.
    """
    H = hidden.shape[-1]
    L = encoder_outputs.shape[0]
    V = params["w_out"].shape[1]
    up = lambda w: w.astype(jnp.float32)
    wa, wc = up(params["wa"]), up(params["wc"])
    wi, wh, wo = up(params["w_i"]), up(params["w_h"]), up(params["w_out"])
    b = params["bias"]
    ba, bc = b[0:1, :L], b[1:2, :H]
    b_i, b_h, b_o = b[2:3, :3 * H], b[3:4, :3 * H], b[4:5, :V]
    enc = encoder_outputs.astype(jnp.bfloat16).astype(jnp.float32)

    emb = params["embedding"][input_idx].reshape(1, H)
    hid = hidden.reshape(1, H)
    eh = jnp.concatenate([emb, hid], axis=-1)
    attn_w = jax.nn.softmax(eh @ wa + ba, axis=1)
    attn_applied = attn_w @ enc
    x = jax.nn.relu(jnp.concatenate([emb, attn_applied], axis=-1) @ wc + bc)
    gi = x @ wi + b_i
    gh = hid @ wh + b_h
    r = jax.nn.sigmoid(gi[:, 0:H] + gh[:, 0:H])
    z = jax.nn.sigmoid(gi[:, H:2 * H] + gh[:, H:2 * H])
    n = jnp.tanh(gi[:, 2 * H:3 * H] + r * gh[:, 2 * H:3 * H])
    h_new = (1.0 - z) * n + z * hid
    logp = jax.nn.log_softmax(h_new @ wo + b_o, axis=1)
    return logp, h_new.reshape(1, 1, H), attn_w


if __name__ == "__main__":
    H, V, L = 32, 16, 8   # hidden_size, output_size (vocab), max_length
    T = 4                  # decode steps for the in-kernel-loop test

    key = jax.random.PRNGKey(0)
    kp, kh, ke = jax.random.split(key, 3)
    params = init_params(kp, H, V, L)

    token_ids = jnp.array([3, 1, 7, 4], jnp.int32)
    hidden0 = jax.random.normal(kh, (1, 1, H), jnp.float32)       # initHidden-like
    encoder_outputs = jax.random.normal(ke, (L, H), jnp.float32)

    # Tolerance absorbs bf16 MXU activation rounding + pl.reciprocal(approx=True)
    # in the attention softmax (weight rounding is shared with the reference).
    ATOL = 3e-2

    # ---- single step == the module's forward() ----
    logp, h_new, attn_w = attn_decoder_forward(params, token_ids[0], hidden0,
                                               encoder_outputs)
    jax.block_until_ready((logp, h_new, attn_w))
    r_logp, r_h, r_attn = _reference_forward(params, token_ids[0], hidden0,
                                             encoder_outputs)
    assert jnp.allclose(attn_w, r_attn, atol=ATOL), "attn_weights mismatch"
    assert jnp.allclose(h_new, r_h, atol=ATOL), "hidden mismatch"
    assert jnp.allclose(logp, r_logp, atol=ATOL), "log_softmax mismatch"

    # ---- in-kernel multi-step decode (weights VMEM-resident across steps) ----
    logps, hiddens, attns = attn_decoder_decode(params, token_ids, hidden0,
                                                encoder_outputs)
    jax.block_until_ready((logps, hiddens, attns))
    hid = hidden0
    for t in range(T):
        rl, rh, ra = _reference_forward(params, token_ids[t], hid, encoder_outputs)
        assert jnp.allclose(logps[t:t + 1], rl, atol=ATOL), f"step {t} logp mismatch"
        assert jnp.allclose(hiddens[t:t + 1], rh.reshape(1, H), atol=ATOL), \
            f"step {t} hidden mismatch"
        assert jnp.allclose(attns[t:t + 1], ra, atol=ATOL), f"step {t} attn mismatch"
        hid = rh

    print("KERNEL_OK")
</pallas_src>

<mosaic_0001>
module attributes {stable_mosaic.version = 11 : i64} {
  func.func @_attn_decoder_kernel(%arg0: i32, %arg1: memref<1xi32, #tpu.memory_space<smem>>, %arg2: memref<1x1x32xf32, #tpu.memory_space<vmem>>, %arg3: memref<1x32xf32, #tpu.memory_space<vmem>>, %arg4: memref<8x32xbf16, #tpu.memory_space<vmem>>, %arg5: memref<64x8xbf16, #tpu.memory_space<vmem>>, %arg6: memref<64x32xbf16, #tpu.memory_space<vmem>>, %arg7: memref<32x96xbf16, #tpu.memory_space<vmem>>, %arg8: memref<32x96xbf16, #tpu.memory_space<vmem>>, %arg9: memref<32x16xbf16, #tpu.memory_space<vmem>>, %arg10: memref<5x128xf32, #tpu.memory_space<vmem>>, %arg11: memref<1x1x128xf32, #tpu.memory_space<vmem>>, %arg12: memref<1x32xf32, #tpu.memory_space<vmem>>) attributes {dimension_semantics = [#tpu.dimension_semantics<arbitrary>], iteration_bounds = array<i64: 1>, scalar_prefetch = 1 : i64, scratch_operands = 1 : i64, tpu.core_type = #tpu.core_type<tc>, window_params = [{transform_indices = @transform_0, window_bounds = array<i64: 1, 1, 32>}, {pipeline_mode = #tpu.pipeline_mode<synchronous>, transform_indices = @transform_1, window_bounds = array<i64: 1, 32>}, {pipeline_mode = #tpu.pipeline_mode<synchronous>, transform_indices = @transform_2, window_bounds = array<i64: 8, 32>}, {pipeline_mode = #tpu.pipeline_mode<synchronous>, transform_indices = @transform_3, window_bounds = array<i64: 64, 8>}, {pipeline_mode = #tpu.pipeline_mode<synchronous>, transform_indices = @transform_4, window_bounds = array<i64: 64, 32>}, {pipeline_mode = #tpu.pipeline_mode<synchronous>, transform_indices = @transform_5, window_bounds = array<i64: 32, 96>}, {pipeline_mode = #tpu.pipeline_mode<synchronous>, transform_indices = @transform_6, window_bounds = array<i64: 32, 96>}, {pipeline_mode = #tpu.pipeline_mode<synchronous>, transform_indices = @transform_7, window_bounds = array<i64: 32, 16>}, {pipeline_mode = #tpu.pipeline_mode<synchronous>, transform_indices = @transform_8, window_bounds = array<i64: 5, 128>}, {transform_indices = @transform_9, window_bounds = array<i64: 1, 1, 128>}]} {
    %c0_i32 = arith.constant 0 : i32
    %0 = arith.cmpi eq, %arg0, %c0_i32 : i32
    %1 = arith.extui %0 : i1 to i32
    %c0_i32_0 = arith.constant 0 : i32
    %2 = arith.cmpi ne, %1, %c0_i32_0 : i32
    scf.if %2 {
      %c0_46 = arith.constant 0 : index
      %c0_47 = arith.constant 0 : index
      %88 = vector.load %arg3[%c0_46, %c0_47] : memref<1x32xf32, #tpu.memory_space<vmem>>, vector<1x32xf32>
      %c0_48 = arith.constant 0 : index
      %c0_49 = arith.constant 0 : index
      %89 = vector.load %arg12[%c0_48, %c0_49] : memref<1x32xf32, #tpu.memory_space<vmem>>, vector<1x32xf32>
      tpu.vector_store %arg12[%c0_48, %c0_49], %88 {strides = array<i32>} : memref<1x32xf32, #tpu.memory_space<vmem>>, vector<1x32xf32>,
    } else {
    }
    %c0 = arith.constant 0 : index
    %c0_1 = arith.constant 0 : index
    %c0_2 = arith.constant 0 : index
    %3 = vector.load %arg2[%c0, %c0_1, %c0_2] : memref<1x1x32xf32, #tpu.memory_space<vmem>>, vector<1x1x32xf32>
    %4 = vector.shape_cast %3 : vector<1x1x32xf32> to vector<1x32xf32>
    %c0_3 = arith.constant 0 : index
    %c0_4 = arith.constant 0 : index
    %5 = vector.load %arg12[%c0_3, %c0_4] : memref<1x32xf32, #tpu.memory_space<vmem>>, vector<1x32xf32>
    %6 = arith.truncf %4 : vector<1x32xf32> to vector<1x32xbf16>
    %7 = arith.truncf %5 : vector<1x32xf32> to vector<1x32xbf16>
    %c0_5 = arith.constant 0 : index
    %c0_6 = arith.constant 0 : index
    %8 = vector.load %arg5[%c0_5, %c0_6] : memref<64x8xbf16, #tpu.memory_space<vmem>>, vector<32x8xbf16>
    %cst = arith.constant dense<0.000000e+00> : vector<1x8xf32>
    %9 = tpu.matmul %6, %8, %cst {dimension_numbers = #tpu.dot_dimension_numbers<[1], [0], [0], [1], [0, 0, 1, 1], [], []>} : vector<1x32xbf16>, vector<32x8xbf16>, vector<1x8xf32> -> vector<1x8xf32>
    %c32 = arith.constant 32 : index
    %c0_7 = arith.constant 0 : index
    %10 = vector.load %arg5[%c32, %c0_7] : memref<64x8xbf16, #tpu.memory_space<vmem>>, vector<32x8xbf16>
    %cst_8 = arith.constant dense<0.000000e+00> : vector<1x8xf32>
    %11 = tpu.matmul %7, %10, %cst_8 {dimension_numbers = #tpu.dot_dimension_numbers<[1], [0], [0], [1], [0, 0, 1, 1], [], []>} : vector<1x32xbf16>, vector<32x8xbf16>, vector<1x8xf32> -> vector<1x8xf32>
    %12 = arith.addf %9, %11 : vector<1x8xf32>
    %c0_9 = arith.constant 0 : index
    %c0_10 = arith.constant 0 : index
    %13 = vector.load %arg10[%c0_9, %c0_10] : memref<5x128xf32, #tpu.memory_space<vmem>>, vector<1x8xf32>
    %14 = arith.addf %12, %13 : vector<1x8xf32>
    %cst_11 = arith.constant dense<0xFF800000> : vector<1xf32>
    %15 = vector.multi_reduction <maximumf>, %14, %cst_11 [1] : vector<1x8xf32> to vector<1xf32>
    %16 = vector.shape_cast %15 : vector<1xf32> to vector<1x1xf32>
    %17 = vector.broadcast %16 : vector<1x1xf32> to vector<1x8xf32>
    %18 = arith.subf %14, %17 : vector<1x8xf32>
    %19 = math.exp %18 : vector<1x8xf32>
    %cst_12 = arith.constant dense<0.000000e+00> : vector<1xf32>
    %20 = vector.multi_reduction <add>, %19, %cst_12 [1] : vector<1x8xf32> to vector<1xf32>
    %21 = vector.shape_cast %20 : vector<1xf32> to vector<1x1xf32>
    %22 = tpu.reciprocal %21 {approx = true} : vector<1x1xf32> -> vector<1x1xf32>
    %23 = vector.broadcast %22 : vector<1x1xf32> to vector<1x8xf32>
    %24 = arith.mulf %19, %23 : vector<1x8xf32>
    %25 = arith.truncf %24 : vector<1x8xf32> to vector<1x8xbf16>
    %c0_13 = arith.constant 0 : index
    %c0_14 = arith.constant 0 : index
    %26 = vector.load %arg4[%c0_13, %c0_14] : memref<8x32xbf16, #tpu.memory_space<vmem>>, vector<8x32xbf16>
    %cst_15 = arith.constant dense<0.000000e+00> : vector<1x32xf32>
    %27 = tpu.matmul %25, %26, %cst_15 {dimension_numbers = #tpu.dot_dimension_numbers<[1], [0], [0], [1], [0, 0, 1, 1], [], []>} : vector<1x8xbf16>, vector<8x32xbf16>, vector<1x32xf32> -> vector<1x32xf32>
    %c0_16 = arith.constant 0 : index
    %c0_17 = arith.constant 0 : index
    %28 = vector.load %arg6[%c0_16, %c0_17] : memref<64x32xbf16, #tpu.memory_space<vmem>>, vector<32x32xbf16>
    %cst_18 = arith.constant dense<0.000000e+00> : vector<1x32xf32>
    %29 = tpu.matmul %6, %28, %cst_18 {dimension_numbers = #tpu.dot_dimension_numbers<[1], [0], [0], [1], [0, 0, 1, 1], [], []>} : vector<1x32xbf16>, vector<32x32xbf16>, vector<1x32xf32> -> vector<1x32xf32>
    %30 = arith.truncf %27 : vector<1x32xf32> to vector<1x32xbf16>
    %c32_19 = arith.constant 32 : index
    %c0_20 = arith.constant 0 : index
    %31 = vector.load %arg6[%c32_19, %c0_20] : memref<64x32xbf16, #tpu.memory_space<vmem>>, vector<32x32xbf16>
    %cst_21 = arith.constant dense<0.000000e+00> : vector<1x32xf32>
    %32 = tpu.matmul %30, %31, %cst_21 {dimension_numbers = #tpu.dot_dimension_numbers<[1], [0], [0], [1], [0, 0, 1, 1], [], []>} : vector<1x32xbf16>, vector<32x32xbf16>, vector<1x32xf32> -> vector<1x32xf32>
    %33 = arith.addf %29, %32 : vector<1x32xf32>
    %c1 = arith.constant 1 : index
    %c0_22 = arith.constant 0 : index
    %34 = vector.load %arg10[%c1, %c0_22] : memref<5x128xf32, #tpu.memory_space<vmem>>, vector<1x32xf32>
    %35 = arith.addf %33, %34 : vector<1x32xf32>
    %cst_23 = arith.constant 0.000000e+00 : f32
    %36 = vector.broadcast %cst_23 : f32 to vector<1x32xf32>
    %37 = arith.maximumf %35, %36 : vector<1x32xf32>
    %38 = arith.truncf %37 : vector<1x32xf32> to vector<1x32xbf16>
    %c0_24 = arith.constant 0 : index
    %c0_25 = arith.constant 0 : index
    %39 = vector.load %arg7[%c0_24, %c0_25] : memref<32x96xbf16, #tpu.memory_space<vmem>>, vector<32x96xbf16>
    %cst_26 = arith.constant dense<0.000000e+00> : vector<1x96xf32>
    %40 = tpu.matmul %38, %39, %cst_26 {dimension_numbers = #tpu.dot_dimension_numbers<[1], [0], [0], [1], [0, 0, 1, 1], [], []>} : vector<1x32xbf16>, vector<32x96xbf16>, vector<1x96xf32> -> vector<1x96xf32>
    %c2 = arith.constant 2 : index
    %c0_27 = arith.constant 0 : index
    %41 = vector.load %arg10[%c2, %c0_27] : memref<5x128xf32, #tpu.memory_space<vmem>>, vector<1x96xf32>
    %42 = arith.addf %40, %41 : vector<1x96xf32>
    %c0_28 = arith.constant 0 : index
    %c0_29 = arith.constant 0 : index
    %43 = vector.load %arg8[%c0_28, %c0_29] : memref<32x96xbf16, #tpu.memory_space<vmem>>, vector<32x96xbf16>
    %cst_30 = arith.constant dense<0.000000e+00> : vector<1x96xf32>
    %44 = tpu.matmul %7, %43, %cst_30 {dimension_numbers = #tpu.dot_dimension_numbers<[1], [0], [0], [1], [0, 0, 1, 1], [], []>} : vector<1x32xbf16>, vector<32x96xbf16>, vector<1x96xf32> -> vector<1x96xf32>
    %c3 = arith.constant 3 : index
    %c0_31 = arith.constant 0 : index
    %45 = vector.load %arg10[%c3, %c0_31] : memref<5x128xf32, #tpu.memory_space<vmem>>, vector<1x96xf32>
    %46 = arith.addf %44, %45 : vector<1x96xf32>
    %47 = vector.extract_strided_slice %42 {offsets = [0, 0], sizes = [1, 64], strides = [1, 1]} : vector<1x96xf32> to vector<1x64xf32>
    %48 = vector.extract_strided_slice %46 {offsets = [0, 0], sizes = [1, 64], strides = [1, 1]} : vector<1x96xf32> to vector<1x64xf32>
    %49 = arith.addf %47, %48 : vector<1x64xf32>
    %50 = arith.negf %49 : vector<1x64xf32>
    %51 = math.exp %50 : vector<1x64xf32>
    %cst_32 = arith.constant 1.000000e+00 : f32
    %52 = vector.broadcast %cst_32 : f32 to vector<1x64xf32>
    %53 = arith.addf %52, %51 : vector<1x64xf32>
    %54 = arith.divf %52, %53 : vector<1x64xf32>
    %55 = vector.extract_strided_slice %54 {offsets = [0, 0], sizes = [1, 32], strides = [1, 1]} : vector<1x64xf32> to vector<1x32xf32>
    %56 = vector.extract_strided_slice %54 {offsets = [0, 32], sizes = [1, 32], strides = [1, 1]} : vector<1x64xf32> to vector<1x32xf32>
    %57 = vector.extract_strided_slice %42 {offsets = [0, 64], sizes = [1, 32], strides = [1, 1]} : vector<1x96xf32> to vector<1x32xf32>
    %58 = vector.extract_strided_slice %46 {offsets = [0, 64], sizes = [1, 32], strides = [1, 1]} : vector<1x96xf32> to vector<1x32xf32>
    %59 = arith.mulf %55, %58 : vector<1x32xf32>
    %60 = arith.addf %57, %59 : vector<1x32xf32>
    %61 = math.tanh %60 : vector<1x32xf32>
    %cst_33 = arith.constant 1.000000e+00 : f32
    %62 = vector.broadcast %cst_33 : f32 to vector<1x32xf32>
    %63 = arith.subf %62, %56 : vector<1x32xf32>
    %64 = arith.mulf %63, %61 : vector<1x32xf32>
    %65 = arith.mulf %56, %5 : vector<1x32xf32>
    %66 = arith.addf %64, %65 : vector<1x32xf32>
    %c0_34 = arith.constant 0 : index
    %c0_35 = arith.constant 0 : index
    %67 = vector.load %arg12[%c0_34, %c0_35] : memref<1x32xf32, #tpu.memory_space<vmem>>, vector<1x32xf32>
    tpu.vector_store %arg12[%c0_34, %c0_35], %66 {strides = array<i32>} : memref<1x32xf32, #tpu.memory_space<vmem>>, vector<1x32xf32>,
    %68 = arith.truncf %66 : vector<1x32xf32> to vector<1x32xbf16>
    %c0_36 = arith.constant 0 : index
    %c0_37 = arith.constant 0 : index
    %69 = vector.load %arg9[%c0_36, %c0_37] : memref<32x16xbf16, #tpu.memory_space<vmem>>, vector<32x16xbf16>
    %cst_38 = arith.constant dense<0.000000e+00> : vector<1x16xf32>
    %70 = tpu.matmul %68, %69, %cst_38 {dimension_numbers = #tpu.dot_dimension_numbers<[1], [0], [0], [1], [0, 0, 1, 1], [], []>} : vector<1x32xbf16>, vector<32x16xbf16>, vector<1x16xf32> -> vector<1x16xf32>
    %c4 = arith.constant 4 : index
    %c0_39 = arith.constant 0 : index
    %71 = vector.load %arg10[%c4, %c0_39] : memref<5x128xf32, #tpu.memory_space<vmem>>, vector<1x16xf32>
    %72 = arith.addf %70, %71 : vector<1x16xf32>
    %cst_40 = arith.constant dense<0xFF800000> : vector<1xf32>
    %73 = vector.multi_reduction <maximumf>, %72, %cst_40 [1] : vector<1x16xf32> to vector<1xf32>
    %74 = vector.shape_cast %73 : vector<1xf32> to vector<1x1xf32>
    %75 = vector.broadcast %74 : vector<1x1xf32> to vector<1x16xf32>
    %76 = arith.subf %72, %75 : vector<1x16xf32>
    %77 = math.exp %76 : vector<1x16xf32>
    %cst_41 = arith.constant dense<0.000000e+00> : vector<1xf32>
    %78 = vector.multi_reduction <add>, %77, %cst_41 [1] : vector<1x16xf32> to vector<1xf32>
    %79 = vector.shape_cast %78 : vector<1xf32> to vector<1x1xf32>
    %80 = math.log %79 : vector<1x1xf32>
    %81 = vector.broadcast %80 : vector<1x1xf32> to vector<1x16xf32>
    %82 = arith.subf %76, %81 : vector<1x16xf32>
    %cst_42 = arith.constant 0.000000e+00 : f32
    %83 = vector.broadcast %cst_42 : f32 to vector<1x72xf32>
    %84 = tpu.concatenate %82, %66, %24, %83 in 1 : vector<1x16xf32>, vector<1x32xf32>, vector<1x8xf32>, vector<1x72xf32> -> vector<1x128xf32>
    %c0_43 = arith.constant 0 : index
    %c0_44 = arith.constant 0 : index
    %c0_45 = arith.constant 0 : index
    %85 = vector.load %arg11[%c0_43, %c0_44, %c0_45] : memref<1x1x128xf32, #tpu.memory_space<vmem>>, vector<1x1x128xf32>
    %86 = vector.shape_cast %85 : vector<1x1x128xf32> to vector<1x128xf32>
    %87 = vector.shape_cast %84 : vector<1x128xf32> to vector<1x1x128xf32>
    tpu.vector_store %arg11[%c0_43, %c0_44, %c0_45], %87 {strides = array<i32>} : memref<1x1x128xf32, #tpu.memory_space<vmem>>, vector<1x1x128xf32>,
    return
  }
  func.func @transform_0(%arg0: i32, %arg1: memref<1xi32, #tpu.memory_space<smem>>) -> (i32, i32, i32) {
    %0 = arith.index_cast %arg0 : i32 to index
    %1 = memref.load %arg1[%0] : memref<1xi32, #tpu.memory_space<smem>>
    %c0_i32 = arith.constant 0 : i32
    %c0_i32_0 = arith.constant 0 : i32
    %c0_i32_1 = arith.constant 0 : i32
    return %1, %c0_i32, %c0_i32_0 : i32, i32, i32
  }
  func.func @transform_1(%arg0: i32, %arg1: memref<1xi32, #tpu.memory_space<smem>>) -> (i32, i32) {
    %c0_i32 = arith.constant 0 : i32
    %c0_i32_0 = arith.constant 0 : i32
    %c0_i32_1 = arith.constant 0 : i32
    return %c0_i32, %c0_i32_0 : i32, i32
  }
  func.func @transform_2(%arg0: i32, %arg1: memref<1xi32, #tpu.memory_space<smem>>) -> (i32, i32) {
    %c0_i32 = arith.constant 0 : i32
    %c0_i32_0 = arith.constant 0 : i32
    %c0_i32_1 = arith.constant 0 : i32
    return %c0_i32, %c0_i32_0 : i32, i32
  }
  func.func @transform_3(%arg0: i32, %arg1: memref<1xi32, #tpu.memory_space<smem>>) -> (i32, i32) {
    %c0_i32 = arith.constant 0 : i32
    %c0_i32_0 = arith.constant 0 : i32
    %c0_i32_1 = arith.constant 0 : i32
    return %c0_i32, %c0_i32_0 : i32, i32
  }
  func.func @transform_4(%arg0: i32, %arg1: memref<1xi32, #tpu.memory_space<smem>>) -> (i32, i32) {
    %c0_i32 = arith.constant 0 : i32
    %c0_i32_0 = arith.constant 0 : i32
    %c0_i32_1 = arith.constant 0 : i32
    return %c0_i32, %c0_i32_0 : i32, i32
  }
  func.func @transform_5(%arg0: i32, %arg1: memref<1xi32, #tpu.memory_space<smem>>) -> (i32, i32) {
    %c0_i32 = arith.constant 0 : i32
    %c0_i32_0 = arith.constant 0 : i32
    %c0_i32_1 = arith.constant 0 : i32
    return %c0_i32, %c0_i32_0 : i32, i32
  }
  func.func @transform_6(%arg0: i32, %arg1: memref<1xi32, #tpu.memory_space<smem>>) -> (i32, i32) {
    %c0_i32 = arith.constant 0 : i32
    %c0_i32_0 = arith.constant 0 : i32
    %c0_i32_1 = arith.constant 0 : i32
    return %c0_i32, %c0_i32_0 : i32, i32
  }
  func.func @transform_7(%arg0: i32, %arg1: memref<1xi32, #tpu.memory_space<smem>>) -> (i32, i32) {
    %c0_i32 = arith.constant 0 : i32
    %c0_i32_0 = arith.constant 0 : i32
    %c0_i32_1 = arith.constant 0 : i32
    return %c0_i32, %c0_i32_0 : i32, i32
  }
  func.func @transform_8(%arg0: i32, %arg1: memref<1xi32, #tpu.memory_space<smem>>) -> (i32, i32) {
    %c0_i32 = arith.constant 0 : i32
    %c0_i32_0 = arith.constant 0 : i32
    %c0_i32_1 = arith.constant 0 : i32
    return %c0_i32, %c0_i32_0 : i32, i32
  }
  func.func @transform_9(%arg0: i32, %arg1: memref<1xi32, #tpu.memory_space<smem>>) -> (i32, i32, i32) {
    %c0_i32 = arith.constant 0 : i32
    %c0_i32_0 = arith.constant 0 : i32
    %c0_i32_1 = arith.constant 0 : i32
    return %arg0, %c0_i32, %c0_i32_0 : i32, i32, i32
  }
}

</mosaic_0001>

<bundles_post_ra>
// kernel: tpu_custom_call.1
= control target key start
LH: loop header
LB: loop body
LE: loop exit
PB: predicated region body
PF: predicated region fallthrough
CT: control target
= control target key end

     0   :  { %v795_v1 = vmov 0.0   ;;  %vm796_vm0 = vmmov 0   ;;  %vm81_vm1 = vcmask 261120   ;;  %vm55_vm2 = vcmask 253952   ;;  %s987_s0 = inlined_call_operand.<no memory space> [shape: s32[1], index: 0, kind: input, shape index: {}]   ;;  %s988_s1 = inlined_call_operand.vmem [shape: f32[16,1,32], index: 1, kind: input, shape index: {}]   ;;  %s989_s2 = inlined_call_operand.vmem [shape: f32[1,32], index: 2, kind: input, shape index: {}]   ;;  %s990_s3 = inlined_call_operand.vmem [shape: bf16[8,32], index: 3, kind: input, shape index: {}]   ;;  %s991_s4 = inlined_call_operand.vmem [shape: bf16[64,8], index: 4, kind: input, shape index: {}]   ;;  %s992_s5 = inlined_call_operand.vmem [shape: bf16[64,32], index: 5, kind: input, shape index: {}]   ;;  %s993_s6 = inlined_call_operand.vmem [shape: bf16[32,96], index: 6, kind: input, shape index: {}]   ;;  %s994_s7 = inlined_call_operand.vmem [shape: bf16[32,96], index: 7, kind: input, shape index: {}]   ;;  %s995_s8 = inlined_call_operand.vmem [shape: bf16[32,16], index: 8, kind: input, shape index: {}]   ;;  %s996_s9 = inlined_call_operand.vmem [shape: f32[5,128], index: 9, kind: input, shape index: {}]   ;;  %s997_s10 = inlined_call_operand.hbm [shape: f32[1,1,128], index: 10, kind: output, shape index: {}]  }
   0x1   :  { %v745_v0 = vld [vmem:[%s991_s4 + $0x8] sm:$0xff]   ;;  %683 = vmatprep.subr.bf16.mxu1 %v795_v1  ;;  %675 = vmatprep.subr.bf16.mxu0 %v795_v1  ;;  %v746_v2 = vld [vmem:[%s991_s4 + $0x18] sm:$0xff]   ;;  %v747_v3 = vld [vmem:[%s991_s4] sm:$0xff]   ;;  %p45_p0 = scmp.lt.s32.totalorder %s987_s0, 15 }
   0x2   :  { %684 = vmatpush3.bf16.msra.mxu1 %v745_v0  ;;  %687 = vmatprep.mubr.msk.bf16.mxu1 %vm796_vm0, %v795_v1  ;;  %v748_v4 = vld [vmem:[%s991_s4 + $0x10] sm:$0xff]   ;;  %v54_v5 = vld [vmem:[%s989_s2] sm:$0x1] }
   0x3   :  { %676 = vmatpush3.bf16.msra.mxu0 %v746_v2  ;;  %685 = vmatprep.subr.bf16.mxu1 %v795_v1  ;;  %s999_s0 = smov (!%p45_p0, %s987_s0), 15  ;;  %56 = vst.msk [vmem:[#allocation2] sm:$0x1] %vm55_vm2, %v54_v5 }
   0x4   :  { %677 = vmatprep.subr.bf16.mxu0 %v795_v1  ;;  %679 = vmatprep.mubr.msk.bf16.mxu0 %vm796_vm0, %v795_v1  ;;  %s47_s28 = scalar_lea.vmem %s988_s1, %s999_s0 }
   0x5   :  { %v57_v6 = vld [vmem:[%s47_s28] sm:$0x1] }
   0x6   :  { %686 = vmatpush3.bf16.msra.mxu1 %v747_v3  ;;  %v59_v7 = vpack.c.bf16 %v57_v6, %v57_v6 }
   0x7   :  { %678 = vmatpush3.bf16.msra.mxu0 %v748_v4  ;;  %697 = vmatprep.subr.bf16.mxu1 %v795_v1 }
   0x8   :  { %691 = vmatprep.subr.bf16.mxu0 %v795_v1 }
   0x9   :  { %688 = vmatmul.mubr.msk.bf16.vlgmr.msra.gmra.mxu1 %vm81_vm1, %v59_v7 }
   0xa   :  { %701 = vmatprep.mubr.msk.bf16.mxu1 %vm796_vm0, %v795_v1 }
   0xb   :  { %16 = vsyncpa [#allocation6], 0  ;;  %v896_v8 = vld [vmem:[#allocation2] sm:$0x1]  ;;  %vm182_vm3 = vcmask 57344   ;;  %vm200_vm4 = vcmask 1043456  }
   0xc   :  { %v60_v9 = vpack.c.bf16 %v896_v8, %v896_v8  ;;  %v180_v14 = vld [vmem:[%s996_s9] sm:$0x1]  ;;  %v751_v29 = vld [vmem:[%s992_s5 + $0x18] sm:$0xff]   ;;  %v752_v30 = vld [vmem:[%s992_s5 + $0x10] sm:$0xff]   ;;  %vm196_vm5 = vcmask 64512   ;;  %s797_s25 = smov 64  }
   0xd   :  { %v195_v27 = vld [vmem:[%s990_s3] sm:$0xf]  ;;  %698 = vmatpush3.bf16.msra.mxu1 %v751_v29  ;;  %v749_v34 = vld [vmem:[%s992_s5 + $0x8] sm:$0xff]   ;;  %s798_s28 = smov 32   ;;  %s799_s30 = smov 96   ;;  %vm585_vm6 = vcmask 122880  }
   0xe   :  { %680 = vmatmul.mubr.msk.bf16.vlgmr.msra.gmra.mxu0 %vm81_vm1, %v60_v9  ;;  %v202_v28 = vsel %vm200_vm4, %v195_v27, 0  ;;  %699 = vmatprep.subr.bf16.mxu1 %v795_v1  ;;  %v750_v36 = vld [vmem:[%s992_s5] sm:$0xff]   ;;  %v753_v37 = vld [vmem:[%s994_s7 + $0x8] sm:$0xff]   ;;  %vm605_vm7 = vcmask 130048   ;;  %vm607_vm8 = vcmask 392192   ;;  %s802_s13 = smov [#allocation5]  }
   0xf   :  { %693 = vmatprep.mubr.msk.bf16.mxu0 %vm796_vm0, %v795_v1  ;;  %692 = vmatpush3.bf16.msra.mxu0 %v202_v28  ;;  %v754_v38 = vld [vmem:[%s994_s7] sm:$0xff]   ;;  %v755_v48 = vld [vmem:[%s993_s6 + $0x8] sm:$0xff]   ;;  %s618_s3 = sshll.u32 %s802_s13, 4  ;;  %vm609_vm9 = vcmask 457728   ;;  %s619_s3 = int_to_ptr.vmem [resolvable:$true] %s618_s3 }
  0x10   :  { %705 = vmatprep.subr.bf16.mxu0 %v795_v1  ;;  %v756_v49 = vld [vmem:[%s993_s6] sm:$0xff]   ;;  %s773_s14 = scalar_lea.vmem %s619_s3, 16  ;;  %s777_s15 = scalar_lea.vmem %s619_s3, 32 }
  0x11   :  { %700 = vmatpush3.bf16.msra.mxu1 %v752_v30  ;;  %v428_v50 = vld [vmem:[%s996_s9 + $0x3] sm:$0x1]  ;;  %v360_v57 = vld [vmem:[%s996_s9 + $0x1] sm:$0x1]  ;;  %v368_v2 = vld [vmem:[%s996_s9 + $0x2] sm:$0x1]  ;;  %p774_p1 = scmp.ne.s32.totalorder %s619_s3, %s773_s14  ;;  %p778_p2 = scmp.lt.s32.totalorder %s619_s3, %s619_s3 }
  0x12   :  { %713 = vmatprep.subr.bf16.mxu1 %v795_v1  ;;  %p779_p3 = scmp.lt.s32.totalorder %s777_s15, %s773_s14 }
  0x14   :  { %p780_p4 = por %p779_p3, %p778_p2 }
  0x16   :  { %p781_p5 = pnand %p780_p4, %p774_p1 }
  0xc9   :  { %v174_v10 = vpop.f32.mrf.mxu1 }
  0xcb   :  { %v689_v11 = vpop.f32.mrf.mxu1 }
  0xcd   :  { %v177_v12 = vpop.f32.mrf.mxu1 }
  0xce   :  { %v119_v13 = vpop.f32.mrf.mxu0 }
  0xcf   :  { %v175_v15 = vadd.f32 %v174_v10, %v119_v13  ;;  %v690_v16 = vpop.f32.mrf.mxu1  ;;  %v506_v13 = vlaneseq }
  0xd0   :  { %v681_v17 = vpop.f32.mrf.mxu0 }
  0xd1   :  { %v181_v18 = vadd.f32 %v180_v14, %v175_v15  ;;  %v507_v14 = vshrl.u32 %v506_v13, 7 }
  0xd2   :  { %v122_v19 = vpop.f32.mrf.mxu0 }
  0xd3   :  { %v183_v20 = vsel %vm182_vm3, %v181_v18, -inf  ;;  %v508_v16 = vsub.s32 0, %v507_v14 }
  0xd4   :  { %v682_v21 = vpop.f32.mrf.mxu0  ;;  %184 = vmax.xlane.f32.xlu0 %v183_v20 }
  0xd5   :  { %v509_v19 = vrot.slane %v896_v8, %v508_v16 }
 0x15d   :  { %v185_v22 = vpop.xlane.xlu0 %184 }
 0x15e   :  { %v186_v23 = vsub.f32 %v181_v18, %v185_v22  ;;  %v757_v22 = vld [vmem:[%s995_s8 + $0x8] sm:$0xff]  }
 0x160   :  { %v187_v24 = vmul.f32 1.442695, %v186_v23  ;;  %v758_v23 = vld [vmem:[%s995_s8] sm:$0xff]   ;;  %s800_s8 = smov 112  }
 0x162   :  { %759 = vpow2.f32 %v187_v24 }
 0x16f   :  { %v760_v25 = vpop.eup %759 }
 0x170   :  { %v189_v26 = vsel %vm182_vm3, %v760_v25, 0.0 }
 0x171   :  { %190 = vadd.xlane.f32.xlu0 %v189_v26 }
 0x1fa   :  { %v191_v31 = vpop.xlane.xlu0 %190 }
 0x1fb   :  { %761 = vrcp.f32 %v191_v31 }
 0x208   :  { %v762_v32 = vpop.eup %761 }
 0x209   :  { %v918_v33 = vmul.f32 %v762_v32, %v760_v25  ;;  %v526_v32 = vld [vmem:[%s996_s9 + $0x4] sm:$0x1]  ;;  %s801_s9 = smov 48  }
 0x20b   :  { %v194_v35 = vpack.c.bf16 %v918_v33, %v918_v33 }
 0x20d   :  { %694 = vmatmul.mubr.msk.bf16.vlgmr.msra.gmra.mxu0 %vm196_vm5, %v194_v35 }
 0x20e   :  { %706 = vmatpush3.bf16.msra.mxu0 %v749_v34  ;;  %709 = vmatprep.mubr.msk.bf16.mxu0 %vm796_vm0, %v795_v1 }
 0x20f   :  { %707 = vmatprep.subr.bf16.mxu0 %v795_v1 }
 0x212   :  { %708 = vmatpush3.bf16.msra.mxu0 %v750_v36 }
 0x213   :  { %721 = vmatprep.subr.bf16.mxu0 %v795_v1 }
 0x215   :  { %710 = vmatmul.mubr.msk.bf16.vlgmr.msra.gmra.mxu0 %vm81_vm1, %v59_v7 }
 0x216   :  { %725 = vmatprep.mubr.msk.bf16.mxu0 %vm796_vm0, %v795_v1  ;;  %722 = vmatpush3.bf16.msra.mxu0 %v753_v37 }
 0x217   :  { %723 = vmatprep.subr.bf16.mxu0 %v795_v1 }
 0x21a   :  { %724 = vmatpush3.bf16.msra.mxu0 %v754_v38 }
 0x21d   :  { %726 = vmatmul.mubr.msk.bf16.vlgmr.msra.gmra.mxu0 %vm81_vm1, %v60_v9 }
 0x2cd   :  { %v238_v39 = vpop.f32.mrf.mxu0 }
 0x2ce   :  { %v248_v40 = vpack.c.bf16 %v238_v39, %v238_v39 }
 0x2cf   :  { %v695_v41 = vpop.f32.mrf.mxu0 }
 0x2d0   :  { %702 = vmatmul.mubr.msk.bf16.vlgmr.msra.gmra.mxu1 %vm81_vm1, %v248_v40 }
 0x2d1   :  { %v241_v42 = vpop.f32.mrf.mxu0  ;;  %717 = vmatprep.mubr.msk.bf16.mxu1 %vm796_vm0, %v795_v1  ;;  %714 = vmatpush3.bf16.msra.mxu1 %v755_v48 }
 0x2d2   :  { %715 = vmatprep.subr.bf16.mxu1 %v795_v1 }
 0x2d3   :  { %v696_v43 = vpop.f32.mrf.mxu0 }
 0x2d5   :  { %v354_v44 = vpop.f32.mrf.mxu0  ;;  %716 = vmatpush3.bf16.msra.mxu1 %v756_v49 }
 0x2d6   :  { %729 = vmatprep.subr.bf16.mxu1 %v795_v1 }
 0x2d7   :  { %v711_v45 = vpop.f32.mrf.mxu0 }
 0x2d9   :  { %v357_v46 = vpop.f32.mrf.mxu0 }
 0x2db   :  { %v712_v47 = vpop.f32.mrf.mxu0 }
 0x2dd   :  { %v475_v51 = vpop.f32.mrf.mxu0 }
 0x2de   :  { %v476_v52 = vadd.f32 %v475_v51, %v428_v50 }
 0x2df   :  { %v727_v53 = vpop.f32.mrf.mxu0 }
 0x2e0   :  { %489 = vrot.lane.b32.xlu1 %v476_v52, %s797_s25 }
 0x2e1   :  { %v478_v54 = vpop.f32.mrf.mxu0 }
 0x2e3   :  { %v728_v55 = vpop.f32.mrf.mxu0 }
 0x352   :  { %v490_v15 = vpop.permute.xlu1 %489 }
 0x390   :  { %v302_v56 = vpop.f32.mrf.mxu1 }
 0x391   :  { %v355_v58 = vadd.f32 %v354_v44, %v302_v56 }
 0x392   :  { %v703_v59 = vpop.f32.mrf.mxu1 }
 0x393   :  { %v361_v60 = vadd.f32 %v360_v57, %v355_v58 }
 0x394   :  { %v305_v61 = vpop.f32.mrf.mxu1 }
 0x395   :  { %v362_v62 = vmax.f32 %v361_v60, 0.0 }
 0x396   :  { %v704_v63 = vpop.f32.mrf.mxu1 }
 0x397   :  { %v363_v0 = vpack.c.bf16 %v362_v62, %v362_v62 }
 0x399   :  { %718 = vmatmul.mubr.msk.bf16.vlgmr.msra.gmra.mxu1 %vm81_vm1, %v363_v0 }
 0x39a   :  { %733 = vmatprep.mubr.msk.bf16.mxu1 %vm796_vm0, %v795_v1  ;;  %730 = vmatpush3.bf16.msra.mxu1 %v757_v22 }
 0x39b   :  { %731 = vmatprep.subr.bf16.mxu1 %v795_v1 }
 0x39e   :  { %732 = vmatpush3.bf16.msra.mxu1 %v758_v23 }
 0x459   :  { %v418_v3 = vpop.f32.mrf.mxu1 }
 0x45a   :  { %v419_v4 = vadd.f32 %v418_v3, %v368_v2 }
 0x45b   :  { %v719_v5 = vpop.f32.mrf.mxu1 }
 0x45c   :  { %v481_v6 = vadd.f32 %v476_v52, %v419_v4 }
 0x45d   :  { %v421_v7 = vpop.f32.mrf.mxu1 }
 0x45e   :  { %v648_v9 = vmul.f32 -1.442695, %v481_v6 }
 0x45f   :  { %v720_v10 = vpop.f32.mrf.mxu1 }
 0x460   :  { %763 = vpow2.f32 %v648_v9 }
 0x46d   :  { %v764_v11 = vpop.eup %763 }
 0x46e   :  { %v485_v12 = vadd.f32 1.0, %v764_v11 }
 0x470   :  { %765 = vrcp.f32 %v485_v12 }
 0x47d   :  { %v766_v17 = vpop.eup %765 }
 0x47e   :  { %v492_v18 = vmul.f32 %v766_v17, %v490_v15  ;;  %v499_v25 = vsub.f32 1.0, %v766_v17 }
 0x480   :  { %494 = vrot.lane.b32.xlu1 %v492_v18, %s797_s25 }
 0x484   :  { %510 = vrot.lane.b32.xlu1 %v509_v19, %s798_s28 }
 0x4f2   :  { %v495_v20 = vpop.permute.xlu1 %494 }
 0x4f3   :  { %v497_v21 = vadd.f32 %v495_v20, %v419_v4 }
 0x4f5   :  { %767 = vtanh.f32 %v497_v21 }
 0x4f6   :  { %v511_v8 = vpop.permute.xlu1 %510 }
 0x4f7   :  { %v513_v27 = vmul.f32 %v766_v17, %v511_v8 }
 0x502   :  { %v768_v24 = vpop.eup %767 }
 0x503   :  { %501 = vrot.lane.b32.xlu0 %v768_v24, %s799_s30 }
 0x575   :  { %v502_v26 = vpop.permute.xlu0 %501 }
 0x576   :  { %v504_v28 = vmul.f32 %v502_v26, %v499_v25 }
 0x578   :  { %v514_v29 = vadd.f32 %v513_v27, %v504_v28 }
 0x57a   :  { %v521_v30 = vpack.c.bf16 %v514_v29, %v514_v29 }
 0x57c   :  { %528 = vrot.lane.b32.xlu1 %v521_v30, %s799_s30 }
 0x5ee   :  { %v529_v31 = vpop.permute.xlu1 %528 }
 0x5ef   :  { %734 = vmatmul.mubr.msk.bf16.vlgmr.msra.gmra.mxu1 %vm81_vm1, %v529_v31 }
 0x6af   :  { %v579_v1 = vpop.f32.mrf.mxu1 }
 0x6b0   :  { %v580_v34 = vadd.f32 %v579_v1, %v526_v32 }
 0x6b1   :  { %v735_v35 = vpop.f32.mrf.mxu1 }
 0x6b2   :  { %v586_v36 = vsel %vm585_vm6, %v580_v34, -inf }
 0x6b3   :  { %587 = vmax.xlane.f32.xlu1 %v586_v36  ;;  %v582_v37 = vpop.f32.mrf.mxu1 }
 0x6b5   :  { %v736_v38 = vpop.f32.mrf.mxu1 }
 0x6c4   :  { %598 = vrot.lane.b32.xlu1 %v514_v29, %s800_s8 }
 0x6c8   :  { %516 = vrot.lane.b32.xlu1 %v514_v29, %s799_s30 }
 0x73c   :  { %v588_v39 = vpop.xlane.xlu1 %587 }
 0x73d   :  { %v589_v40 = vsub.f32 %v580_v34, %v588_v39 }
 0x73f   :  { %v590_v41 = vmul.f32 1.442695, %v589_v40 }
 0x740   :  { %v599_v42 = vpop.permute.xlu1 %598 }
 0x741   :  { %769 = vpow2.f32 %v590_v41 }
 0x744   :  { %v517_v43 = vpop.permute.xlu1 %516 }
 0x745   :  { %520 = vst.msk [vmem:[#allocation2] sm:$0x1] %vm55_vm2, %v517_v43 }
 0x74e   :  { %v770_v44 = vpop.eup %769 }
 0x74f   :  { %v592_v45 = vsel %vm585_vm6, %v770_v44, 0.0 }
 0x750   :  { %593 = vadd.xlane.f32.xlu0 %v592_v45 }
 0x766   :  { %602 = vrot.lane.b32.xlu0 %v918_v33, %s801_s9 }
 0x7d9   :  { %v594_v46 = vpop.xlane.xlu0 %593 }
 0x7da   :  { %771 = vlog2.f32 %v594_v46 }
 0x7dd   :  { %v603_v50 = vpop.permute.xlu0 %602 }
 0x7e7   :  { %v772_v47 = vpop.eup %771 }
 0x7e8   :  { %v596_v48 = vmul.f32 0.6931472, %v772_v47 }
 0x7ea   :  { %v597_v49 = vsub.f32 %v589_v40, %v596_v48 }
 0x7ec   :  { %v606_v51 = vsel %vm605_vm7, %v597_v49, %v599_v42 }
 0x7ed   :  { %v608_v52 = vsel %vm607_vm8, %v606_v51, %v603_v50 }
 0x7ee   :  { %v610_v53 = vsel %vm609_vm9, %v608_v52, 0.0 }
 0x7ef   :  { %611 = vst [vmem:[#allocation5] sm:$0x1] %v610_v53 }
 0x7f0   :  { %784 = shalt.err (!%p781_p5)
}
 0x7f1   :  { %621 = dma.vmem_to_hbm [thread:$0]  %s619_s3, 16, %s997_s10, [#allocation6]  }
 0x7f2   :  { %793 = dma.done.wait [#allocation6], 16  }
 0x7f3   :  { %794 = vsyncadd [#allocation6], 4294967280 }
 0x7f4   :  { %625 = vsyncpa [#allocation6], 1 }

</bundles_post_ra>
